<compile_context>
chip_gen: v7x
topology: tpu7x:2x2x1
jax: 0.10.0
libtpu: 0.0.40
codegen_flags: <defaults>
</compile_context>

<pallas_src>
import functools
import math

import jax
import jax.numpy as jnp
from jax.experimental import pallas as pl
from jax.experimental.pallas import tpu as pltpu


def _pe_add_kernel(x_ref, pe_ref, o_ref, *, batch: int, d_model: int):
    """x_ref/o_ref block: (tile_s, batch*d_model); pe_ref block: (tile_s, d_model).

    Broadcast-add pe over the batch dim using static lane slices: each batch
    element occupies a contiguous d_model-wide lane window of the flattened
    feature axis.  Accumulate in f32, downcast once on store.
    """
    pe = pe_ref[...].astype(jnp.float32)  # (tile_s, d_model)
    for b in range(batch):
        lo = b * d_model
        hi = lo + d_model
        o_ref[:, lo:hi] = (
            x_ref[:, lo:hi].astype(jnp.float32) + pe
        ).astype(o_ref.dtype)


def _build_pe_table(seq_len: int, d_model: int) -> jax.Array:
    """Dense (seq_len, d_model) f32 sinusoid table == PyTorch pe buffer rows [:seq_len]."""
    position = jnp.arange(seq_len, dtype=jnp.float32)[:, None]            # (S, 1)
    div_term = jnp.exp(
        jnp.arange(0, d_model, 2, dtype=jnp.float32) * (-math.log(10000.0) / d_model)
    )                                                                     # (ceil(D/2),)
    angles = position * div_term                                          # (S, ceil(D/2))
    pe = jnp.zeros((seq_len, d_model), dtype=jnp.float32)
    pe = pe.at[:, 0::2].set(jnp.sin(angles))
    if d_model > 1:
        pe = pe.at[:, 1::2].set(jnp.cos(angles[:, : d_model // 2]))
    return pe


def _round_up(n: int, m: int) -> int:
    return ((n + m - 1) // m) * m


def _generation_config() -> tuple[int, int, int]:
    """Returns (VMEM working-set target bytes, vmem_limit_bytes, TensorCores/chip)."""
    try:
        kind = jax.devices()[0].device_kind.lower().replace(" ", "")
    except Exception:
        kind = ""
    if "v7" in kind or "tpu7" in kind:
        # 64 MiB physical VMEM, 3.2 TB/s HBM, 2 TensorCores per chip.
        return 32 * 1024 * 1024, 48 * 1024 * 1024, 2
    if "v5" in kind or "v6" in kind:
        # 128 MiB physical VMEM, ~0.8-1.4 TB/s HBM, single TensorCore.
        return 56 * 1024 * 1024, 80 * 1024 * 1024, 1
    # Unknown / older generation: stay conservative.
    return 20 * 1024 * 1024, 32 * 1024 * 1024, 1


def sinusoidal_positional_encoding(x: jax.Array, max_len: int = 512) -> jax.Array:
    """x: (seq_len, batch, d_model) -> x + pe[:seq_len], broadcast over batch."""
    S, B, D = x.shape
    assert S <= max_len, "sequence length exceeds max_len"
    BD = B * D

    # Dense (S, D) table in x.dtype (pe read traffic is 1/B of x read traffic).
    pe = _build_pe_table(S, D).astype(x.dtype)

    # Flatten (S, B, D) -> (S, B*D): free collapsing reshape; seq -> sublanes,
    # features -> lanes for every operand (no size-1 sublane padding anywhere).
    x2 = x.reshape(S, BD)

    # ---- padding-aware tile sizing against a per-generation VMEM target ----
    target_bytes, vmem_limit, n_cores = _generation_config()
    x_row = _round_up(BD, 128) * x.dtype.itemsize          # padded bytes / seq row
    pe_row = _round_up(D, 128) * pe.dtype.itemsize
    per_row = 2 * (2 * x_row + pe_row)                     # double-buffered in + out + pe
    sub = max(8, (8 * 4) // x.dtype.itemsize)              # sublane granule: f32->8, bf16->16

    tile_s = max(1, min(S, target_bytes // per_row))
    if tile_s < S:
        # Block does not span the full seq dim -> keep its sublane extent a
        # multiple of the granule (dense tiles / unmasked sublanes).
        tile_s = min(S, max(sub, tile_s - tile_s % sub))
    if n_cores >= 2 and S > 1:
        # v7x only: ensure >= 2 roughly equal, granule-aligned steps so both
        # TensorCores get balanced work.  Skip for tiny S where a single
        # full-extent block is required for alignment anyway.
        half = _round_up(pl.cdiv(S, 2), sub)
        if half < S:
            tile_s = min(tile_s, half)

    grid = (pl.cdiv(S, tile_s),)                            # ragged last tile is masked

    kernel = functools.partial(_pe_add_kernel, batch=B, d_model=D)

    out = pl.pallas_call(
        kernel,
        out_shape=jax.ShapeDtypeStruct((S, BD), x.dtype),
        grid_spec=pltpu.PrefetchScalarGridSpec(
            num_scalar_prefetch=0,
            grid=grid,
            in_specs=[
                pl.BlockSpec((tile_s, BD), lambda i: (i, 0)),
                pl.BlockSpec((tile_s, D), lambda i: (i, 0)),
            ],
            out_specs=pl.BlockSpec((tile_s, BD), lambda i: (i, 0)),
        ),
        input_output_aliases={0: 0},   # in-place add when x is donatable
        compiler_params=pltpu.CompilerParams(
            dimension_semantics=("parallel",),
            vmem_limit_bytes=vmem_limit,
        ),
    )(x2, pe)

    return out.reshape(S, B, D)


def _reference(x: jax.Array, max_len: int = 512) -> jax.Array:
    """Pure-JAX mirror of the PyTorch module (f32 pe buffer)."""
    S, _, D = x.shape
    position = jnp.arange(max_len, dtype=jnp.float32)[:, None]
    div_term = jnp.exp(jnp.arange(0, D, 2, dtype=jnp.float32) * (-math.log(10000.0) / D))
    angles = position * div_term
    pe = jnp.zeros((max_len, 1, D), dtype=jnp.float32)
    pe = pe.at[:, 0, 0::2].set(jnp.sin(angles))
    pe = pe.at[:, 0, 1::2].set(jnp.cos(angles[:, : D // 2]))
    return (x + pe[:S]).astype(x.dtype)


if __name__ == "__main__":
    key = jax.random.PRNGKey(0)
    seq, batch, d_model = 8, 2, 32
    x = jax.random.normal(key, (seq, batch, d_model), dtype=jnp.float32)

    # Compute the reference first so the check is independent of in-place aliasing.
    ref = jax.block_until_ready(_reference(x))

    out = jax.block_until_ready(sinusoidal_positional_encoding(x))

    assert out.shape == x.shape and out.dtype == x.dtype
    assert jnp.allclose(out, ref, atol=1e-5, rtol=1e-5)

    print("KERNEL_OK")
</pallas_src>

<mosaic_0001>
module attributes {stable_mosaic.version = 11 : i64} {
  func.func @_pe_add_kernel(%arg0: i32, %arg1: memref<8x64xf32, #tpu.memory_space<vmem>>, %arg2: memref<8x32xf32, #tpu.memory_space<vmem>>, %arg3: memref<8x64xf32, #tpu.memory_space<vmem>>) attributes {dimension_semantics = [#tpu.dimension_semantics<parallel>], iteration_bounds = array<i64: 1>, scalar_prefetch = 0 : i64, scratch_operands = 0 : i64, tpu.core_type = #tpu.core_type<tc>, window_params = [{transform_indices = @transform_0, window_bounds = array<i64: 8, 64>}, {transform_indices = @transform_1, window_bounds = array<i64: 8, 32>}, {transform_indices = @transform_2, window_bounds = array<i64: 8, 64>}]} {
    %c0 = arith.constant 0 : index
    %c0_0 = arith.constant 0 : index
    %0 = vector.load %arg2[%c0, %c0_0] : memref<8x32xf32, #tpu.memory_space<vmem>>, vector<8x32xf32>
    %c0_1 = arith.constant 0 : index
    %c0_2 = arith.constant 0 : index
    %1 = vector.load %arg1[%c0_1, %c0_2] : memref<8x64xf32, #tpu.memory_space<vmem>>, vector<8x32xf32>
    %2 = arith.addf %1, %0 : vector<8x32xf32>
    %c0_3 = arith.constant 0 : index
    %c0_4 = arith.constant 0 : index
    %3 = vector.load %arg3[%c0_3, %c0_4] : memref<8x64xf32, #tpu.memory_space<vmem>>, vector<8x32xf32>
    tpu.vector_store %arg3[%c0_3, %c0_4], %2 {strides = array<i32>} : memref<8x64xf32, #tpu.memory_space<vmem>>, vector<8x32xf32>,
    %c0_5 = arith.constant 0 : index
    %c32 = arith.constant 32 : index
    %4 = vector.load %arg1[%c0_5, %c32] : memref<8x64xf32, #tpu.memory_space<vmem>>, vector<8x32xf32>
    %5 = arith.addf %4, %0 : vector<8x32xf32>
    %c0_6 = arith.constant 0 : index
    %c32_7 = arith.constant 32 : index
    %6 = vector.load %arg3[%c0_6, %c32_7] : memref<8x64xf32, #tpu.memory_space<vmem>>, vector<8x32xf32>
    tpu.vector_store %arg3[%c0_6, %c32_7], %5 {strides = array<i32>} : memref<8x64xf32, #tpu.memory_space<vmem>>, vector<8x32xf32>,
    return
  }
  func.func @transform_0(%arg0: i32) -> (i32, i32) {
    %c0_i32 = arith.constant 0 : i32
    %c0_i32_0 = arith.constant 0 : i32
    return %arg0, %c0_i32 : i32, i32
  }
  func.func @transform_1(%arg0: i32) -> (i32, i32) {
    %c0_i32 = arith.constant 0 : i32
    %c0_i32_0 = arith.constant 0 : i32
    return %arg0, %c0_i32 : i32, i32
  }
  func.func @transform_2(%arg0: i32) -> (i32, i32) {
    %c0_i32 = arith.constant 0 : i32
    %c0_i32_0 = arith.constant 0 : i32
    return %arg0, %c0_i32 : i32, i32
  }
}

</mosaic_0001>

<bundles_post_ra>
// kernel: tpu_custom_call.1
= control target key start
LH: loop header
LB: loop body
LE: loop exit
PB: predicated region body
PF: predicated region fallthrough
CT: control target
= control target key end

     0   :  { %7 = vsyncpa [#allocation3], 0  ;;  %s148_s0 = inlined_call_operand.hbm [shape: f32[8,64], index: 0, kind: input, shape index: {}, may-alias: {0,2}]   ;;  %s149_s1 = inlined_call_operand.vmem [shape: f32[8,32], index: 1, kind: input, shape index: {}]   ;;  %s150_s2 = inlined_call_operand.hbm [shape: f32[8,64], index: 2, kind: output, shape index: {}, may-alias: {0,2}]  }
   0x1   :  { %8 = vsyncpa [#allocation4], 0  ;;  %s103_s9 = smov [#allocation2]   ;;  %s55_s13 = scalar_lea.hbm %s148_s0, 128 }
   0x2   :  { %s15_s10 = sshll.u32 %s103_s9, 4  ;;  %p56_p0 = scmp.ne.s32.totalorder %s148_s0, %s55_s13  ;;  %s16_s10 = int_to_ptr.vmem [resolvable:$true] %s15_s10 }
   0x3   :  { %p59_p1 = scmp.lt.u32.totalorder %s55_s13, %s148_s0 }
   0x5   :  { %p61_p2 = pnand %p59_p1, %p56_p0 }
   0x7   :  { %64 = shalt.err (!%p61_p2)
}
   0x8   :  { %s65_s18 = scalar_lea.vmem %s16_s10, 128  ;;  %p70_p4 = scmp.lt.s32.totalorder %s16_s10, %s16_s10 }
   0x9   :  { %p66_p3 = scmp.ne.s32.totalorder %s16_s10, %s65_s18  ;;  %p71_p5 = scmp.lt.s32.totalorder %s65_s18, %s65_s18 }
   0xb   :  { %p72_p6 = por %p71_p5, %p70_p4 }
   0xd   :  { %p73_p7 = pnand %p72_p6, %p66_p3 }
   0xf   :  { %76 = shalt.err (!%p73_p7)
}
  0x10   :  { %18 = dma.hbm_to_vmem [thread:$0]  %s148_s0, 128, %s16_s10, [#allocation3]  }
  0x11   :  { %99 = dma.done.wait [#allocation3], 128  }
  0x12   :  { %100 = vsyncadd [#allocation3], 4294967168  ;;  %v24_v0 = vld [vmem:[%s149_s1] sm:$0xff]  ;;  %vm27_vm0 = vcmask 261120   ;;  %s104_s23 = smov 32   ;;  %s105_s24 = smov [#allocation5]  }
  0x13   :  { %v25_v1 = vld [vmem:[#allocation2] sm:$0xff]  ;;  %31 = vrot.lane.b32.xlu0 %v24_v0, %s104_s23  ;;  %s43_s25 = sshll.u32 %s105_s24, 4  ;;  %vm35_vm1 = vcmask 523520   ;;  %s44_s25 = int_to_ptr.vmem [resolvable:$true] %s43_s25 }
  0x14   :  { %v26_v2 = vadd.f32 %v25_v1, %v24_v0  ;;  %s77_s0 = scalar_lea.vmem %s44_s25, 128  ;;  %p82_p9 = scmp.lt.s32.totalorder %s44_s25, %s44_s25 }
  0x15   :  { %p78_p8 = scmp.ne.s32.totalorder %s44_s25, %s77_s0  ;;  %p83_p10 = scmp.lt.s32.totalorder %s77_s0, %s77_s0 }
  0x16   :  { %28 = vst.msk [vmem:[#allocation5] sm:$0xff] %vm27_vm0, %v26_v2 }
  0x17   :  { %p84_p11 = por %p83_p10, %p82_p9 }
  0x19   :  { %p85_p12 = pnand %p84_p11, %p78_p8 }
  0x85   :  { %v32_v3 = vpop.permute.xlu0 %31 }
  0x86   :  { %v34_v4 = vadd.f32 %v32_v3, %v25_v1 }
  0x88   :  { %36 = vst.msk [vmem:[#allocation5] sm:$0xff] %vm35_vm1, %v34_v4 }
  0x89   :  { %88 = shalt.err (!%p85_p12)
}
  0x8a   :  { %s89_s27 = scalar_lea.hbm %s150_s2, 128 }
  0x8b   :  { %p90_p13 = scmp.ne.s32.totalorder %s150_s2, %s89_s27  ;;  %p93_p0 = scmp.lt.u32.totalorder %s89_s27, %s150_s2 }
  0x8d   :  { %p95_p1 = pnand %p93_p0, %p90_p13 }
  0x8f   :  { %98 = shalt.err (!%p95_p1)
}
  0x90   :  { %46 = dma.vmem_to_hbm [thread:$0]  %s44_s25, 128, %s150_s2, [#allocation4]  }
  0x91   :  { %101 = dma.done.wait [#allocation4], 128  }
  0x92   :  { %102 = vsyncadd [#allocation4], 4294967168 }
  0x93   :  { %50 = vsyncpa [#allocation3], 1 }
  0x94   :  { %51 = vsyncpa [#allocation4], 1 }

</bundles_post_ra>
